<compile_context>
chip_gen: v6e
topology: v6e:2x2x1
jax: 0.10.0
libtpu: 0.0.40
codegen_flags: <defaults>
</compile_context>

<pallas_src>
import functools

import jax
import jax.numpy as jnp
from jax.experimental import pallas as pl
from jax.experimental.pallas import tpu as pltpu


def _round_up(n, m):
    return (n + m - 1) // m * m


# ----------------------------- Pallas kernel -------------------------------
def _varann_kernel(x_ref, w_in_ref, w_stack_ref, b_stack_ref, o_ref, *, n_hidden):
    # x_ref:       (F, tile_b)          batch in lanes
    # w_in_ref:    (H, F)               normalization already folded in
    # w_stack_ref: (n_hidden+1, H, H)   hidden weights then output weight (row 0)
    # b_stack_ref: (n_hidden+2, H, 1)   [folded b_in, hidden biases..., b_out]
    # o_ref:       (1, tile_b)          lane-dense output row

    def _silu(z):
        # silu(z) = z * sigmoid(z);  sigmoid via a single EUP tanh
        return z * (0.5 * (jnp.tanh(0.5 * z) + 1.0))

    # input layer: (H, F) @ (F, tile_b) -> (H, tile_b)
    z = jnp.dot(w_in_ref[...], x_ref[...], preferred_element_type=jnp.float32)
    h = _silu(z + b_stack_ref[0])

    # hidden layers (static trip count -> unrolled in the trace)
    for i in range(n_hidden):
        z = jnp.dot(w_stack_ref[i], h, preferred_element_type=jnp.float32)
        h = _silu(z + b_stack_ref[i + 1])

    # output layer: only row 0 of the padded output weight is real
    z = jnp.dot(w_stack_ref[n_hidden], h, preferred_element_type=jnp.float32)
    b_out = b_stack_ref[n_hidden + 1]                      # (H, 1)
    z0 = z[0:1, :] + b_out[0:1]                            # (1, tile_b)
    # -18 + 2*18*sigmoid(z) == 18 * tanh(z / 2)   (exact identity)
    o_ref[...] = 18.0 * jnp.tanh(0.5 * z0)


# ----------------- One-time parameter folding / packing ---------------------
def prepare_params(params, env_params):
    """Fold normalization into the first Linear and pack params feature-major.

    Called ONCE (outside the per-call path): no per-call array surgery.
    Layout is transposed vs PyTorch activations: the kernel computes
        h_t = W @ h_t + b        with h_t of shape (H, batch).
    """
    w_in = params["w_in"].astype(jnp.float32)    # (F, H)   x @ w_in convention
    b_in = params["b_in"].astype(jnp.float32)    # (1, H)
    w_h = params["w_h"].astype(jnp.float32)      # (n_hidden, H, H)
    b_h = params["b_h"].astype(jnp.float32)      # (n_hidden, 1, H)
    w_out = params["w_out"].astype(jnp.float32)  # (H, 1)
    b_out = params["b_out"].astype(jnp.float32)  # (1, 1)

    F, H = w_in.shape
    n_hidden = w_h.shape[0]
    assert F >= 3, "normalize_features hard-codes feature columns 0/1/2"

    # normalize_features as per-feature affine (x - offset) * scale, folded
    # into the first Linear (columns 0/1/2 like the PyTorch module).
    scale = jnp.ones((F,), jnp.float32)
    offset = jnp.zeros((F,), jnp.float32)
    scale = scale.at[0].set(1.0 / env_params["Ndt"])
    scale = scale.at[1].set(1.0 / 0.5)
    scale = scale.at[2].set(1.0 / env_params["max_q"])
    offset = offset.at[1].set(env_params["theta"])

    w_in_f = scale[:, None] * w_in                        # (F, H)
    b_in_f = b_in - (offset * scale)[None, :] @ w_in      # (1, H)

    # pad H up to a multiple of 8 (sublane); padded rows stay exactly zero
    H_pad = max(8, _round_up(H, 8))
    ph = H_pad - H

    # feature-major: out-features in sublanes, batch will live in lanes
    w_in_k = jnp.pad(w_in_f.T, ((0, ph), (0, 0)))                           # (H_pad, F)
    w_h_k = jnp.pad(jnp.swapaxes(w_h, 1, 2), ((0, 0), (0, ph), (0, ph)))    # (n_h, H_pad, H_pad)
    w_out_k = jnp.zeros((1, H_pad, H_pad), jnp.float32).at[0, 0, :H].set(w_out[:, 0])
    w_stack = jnp.concatenate([w_h_k, w_out_k], axis=0)                     # (n_h+1, H_pad, H_pad)

    b_in_k = jnp.pad(b_in_f.T, ((0, ph), (0, 0)))[None]                     # (1, H_pad, 1)
    b_h_k = jnp.pad(jnp.swapaxes(b_h, 1, 2), ((0, 0), (0, ph), (0, 0)))     # (n_h, H_pad, 1)
    b_out_k = jnp.zeros((1, H_pad, 1), jnp.float32).at[0, 0, 0].set(b_out[0, 0])
    b_stack = jnp.concatenate([b_in_k, b_h_k, b_out_k], axis=0)             # (n_h+2, H_pad, 1)

    return {"w_in": w_in_k, "w_stack": w_stack, "b_stack": b_stack,
            "n_hidden": n_hidden}


# ------------------------------ Wrapper -------------------------------------
def varann_forward(x, prepared, *, tile_b=2048):
    """x: (B, input_size) float32.  Returns (B, 1) float32."""
    B, F = x.shape
    n_hidden = prepared["n_hidden"]
    w_in = prepared["w_in"]          # (H_pad, F)
    w_stack = prepared["w_stack"]    # (n_hidden+1, H_pad, H_pad)
    b_stack = prepared["b_stack"]    # (n_hidden+2, H_pad, 1)
    H_pad = w_in.shape[0]

    # lane-dense batch tiling: tile_b is a multiple of 128
    B128 = _round_up(B, 128)
    tile_b = _round_up(min(tile_b, B128), 128)
    # guarantee >= 2 grid steps when the batch permits, so the "parallel"
    # batch axis shards across both TensorCores on v7x
    if B128 // tile_b < 2 and B128 >= 256:
        tile_b = _round_up(B128 // 2, 128)
    B_pad = _round_up(B, tile_b)

    # feature-major, lane-dense input: (F, B_pad) with batch in lanes
    x_t = jnp.pad(x.T, ((0, 0), (0, B_pad - B)))

    n_w = w_stack.shape[0]
    n_b = b_stack.shape[0]
    grid = (B_pad // tile_b,)

    kernel = functools.partial(_varann_kernel, n_hidden=n_hidden)
    out = pl.pallas_call(
        kernel,
        out_shape=jax.ShapeDtypeStruct((1, B_pad), jnp.float32),
        grid=grid,
        in_specs=[
            pl.BlockSpec((F, tile_b), lambda i: (0, i)),
            # weights/biases: constant block index -> VMEM-resident across steps
            pl.BlockSpec((H_pad, F), lambda i: (0, 0)),
            pl.BlockSpec((n_w, H_pad, H_pad), lambda i: (0, 0, 0)),
            pl.BlockSpec((n_b, H_pad, 1), lambda i: (0, 0, 0)),
        ],
        out_specs=pl.BlockSpec((1, tile_b), lambda i: (0, i)),
        compiler_params=pltpu.CompilerParams(
            dimension_semantics=("parallel",),
            vmem_limit_bytes=32 * 1024 * 1024),
    )(x_t, w_in, w_stack, b_stack)

    # lane-dense (1, B_pad) row back to the module's (B, 1) convention
    return out[0, :B][:, None]


# ------------------------- Deterministic parameter init ---------------------
def init_params(key, input_size, hidden_size, n_layers):
    n_hidden = n_layers - 1
    ks = jax.random.split(key, 6)
    s = 0.1
    return {
        # stored as (in, out) == PyTorch W.T so the reference does x @ W + b
        "w_in": s * jax.random.normal(ks[0], (input_size, hidden_size), jnp.float32),
        "b_in": s * jax.random.normal(ks[1], (1, hidden_size), jnp.float32),
        "w_h": s * jax.random.normal(ks[2], (n_hidden, hidden_size, hidden_size), jnp.float32),
        "b_h": s * jax.random.normal(ks[3], (n_hidden, 1, hidden_size), jnp.float32),
        "w_out": s * jax.random.normal(ks[4], (hidden_size, 1), jnp.float32),
        "b_out": s * jax.random.normal(ks[5], (1, 1), jnp.float32),
    }


# ------------------------- Pure-JAX reference (for check) -------------------
def varann_reference(x, params, env_params):
    x = x.at[..., 0].divide(env_params["Ndt"])
    x = x.at[..., 1].set((x[..., 1] - env_params["theta"]) / 0.5)
    x = x.at[..., 2].divide(env_params["max_q"])
    h = jax.nn.silu(x @ params["w_in"] + params["b_in"])
    for i in range(params["w_h"].shape[0]):
        h = jax.nn.silu(h @ params["w_h"][i] + params["b_h"][i])
    z = h @ params["w_out"] + params["b_out"]
    return -18.0 + 36.0 * jax.nn.sigmoid(z)


if __name__ == "__main__":
    # input_size=3 (time, spread, inventory), hidden_size=32, n_layers=3
    # (=> 2 hidden Linear layers).
    B, INPUT_SIZE, HIDDEN_SIZE, N_LAYERS = 64, 3, 32, 3
    env_params = {"Ndt": 10.0, "theta": 1.0, "max_q": 5.0}

    key = jax.random.PRNGKey(0)
    k_x, k_p, k_x2 = jax.random.split(key, 3)
    params = init_params(k_p, INPUT_SIZE, HIDDEN_SIZE, N_LAYERS)
    prepared = prepare_params(params, env_params)   # one-time fold/pack/pad

    # small batch: 1-step grid, batch padded 64 -> 128 lanes and sliced off
    x = jax.random.normal(k_x, (B, INPUT_SIZE), jnp.float32)
    out = jax.block_until_ready(varann_forward(x, prepared))
    ref = varann_reference(x, params, env_params)
    assert out.shape == (B, 1)
    assert jnp.allclose(out, ref, atol=5e-4, rtol=5e-4)

    # larger batch: exercises the >=2-step "parallel" grid (both TCs on v7x)
    B2 = 300
    x2 = jax.random.normal(k_x2, (B2, INPUT_SIZE), jnp.float32)
    out2 = jax.block_until_ready(varann_forward(x2, prepared))
    ref2 = varann_reference(x2, params, env_params)
    assert out2.shape == (B2, 1)
    assert jnp.allclose(out2, ref2, atol=5e-4, rtol=5e-4)

    print("KERNEL_OK")
</pallas_src>

<mosaic_0001>
module attributes {stable_mosaic.version = 11 : i64} {
  func.func @_varann_kernel(%arg0: i32, %arg1: memref<3x128xf32, #tpu.memory_space<vmem>>, %arg2: memref<32x3xf32, #tpu.memory_space<vmem>>, %arg3: memref<3x32x32xf32, #tpu.memory_space<vmem>>, %arg4: memref<4x32x1xf32, #tpu.memory_space<vmem>>, %arg5: memref<1x128xf32, #tpu.memory_space<vmem>>) attributes {dimension_semantics = [#tpu.dimension_semantics<parallel>], iteration_bounds = array<i64: 1>, scalar_prefetch = 0 : i64, scratch_operands = 0 : i64, tpu.core_type = #tpu.core_type<tc>, window_params = [{transform_indices = @transform_0, window_bounds = array<i64: 3, 128>}, {pipeline_mode = #tpu.pipeline_mode<synchronous>, transform_indices = @transform_1, window_bounds = array<i64: 32, 3>}, {pipeline_mode = #tpu.pipeline_mode<synchronous>, transform_indices = @transform_2, window_bounds = array<i64: 3, 32, 32>}, {pipeline_mode = #tpu.pipeline_mode<synchronous>, transform_indices = @transform_3, window_bounds = array<i64: 4, 32, 1>}, {transform_indices = @transform_4, window_bounds = array<i64: 1, 128>}]} {
    %c0 = arith.constant 0 : index
    %c0_0 = arith.constant 0 : index
    %0 = vector.load %arg2[%c0, %c0_0] : memref<32x3xf32, #tpu.memory_space<vmem>>, vector<32x3xf32>
    %c0_1 = arith.constant 0 : index
    %c0_2 = arith.constant 0 : index
    %1 = vector.load %arg1[%c0_1, %c0_2] : memref<3x128xf32, #tpu.memory_space<vmem>>, vector<3x128xf32>
    %cst = arith.constant dense<0.000000e+00> : vector<32x128xf32>
    %2 = tpu.matmul %0, %1, %cst {dimension_numbers = #tpu.dot_dimension_numbers<[1], [0], [0], [1], [0, 0, 1, 1], [], []>} : vector<32x3xf32>, vector<3x128xf32>, vector<32x128xf32> -> vector<32x128xf32>
    %c0_3 = arith.constant 0 : index
    %c0_4 = arith.constant 0 : index
    %c0_5 = arith.constant 0 : index
    %3 = vector.load %arg4[%c0_3, %c0_4, %c0_5] : memref<4x32x1xf32, #tpu.memory_space<vmem>>, vector<1x32x1xf32>
    %4 = vector.shape_cast %3 : vector<1x32x1xf32> to vector<32x1xf32>
    %5 = vector.broadcast %4 : vector<32x1xf32> to vector<32x128xf32>
    %6 = arith.addf %2, %5 : vector<32x128xf32>
    %cst_6 = arith.constant 5.000000e-01 : f32
    %7 = vector.broadcast %cst_6 : f32 to vector<32x128xf32>
    %8 = arith.mulf %7, %6 : vector<32x128xf32>
    %9 = math.tanh %8 : vector<32x128xf32>
    %cst_7 = arith.constant 1.000000e+00 : f32
    %10 = vector.broadcast %cst_7 : f32 to vector<32x128xf32>
    %11 = arith.addf %9, %10 : vector<32x128xf32>
    %cst_8 = arith.constant 5.000000e-01 : f32
    %12 = vector.broadcast %cst_8 : f32 to vector<32x128xf32>
    %13 = arith.mulf %12, %11 : vector<32x128xf32>
    %14 = arith.mulf %6, %13 : vector<32x128xf32>
    %c0_9 = arith.constant 0 : index
    %c0_10 = arith.constant 0 : index
    %c0_11 = arith.constant 0 : index
    %15 = vector.load %arg3[%c0_9, %c0_10, %c0_11] : memref<3x32x32xf32, #tpu.memory_space<vmem>>, vector<1x32x32xf32>
    %16 = vector.shape_cast %15 : vector<1x32x32xf32> to vector<32x32xf32>
    %cst_12 = arith.constant dense<0.000000e+00> : vector<32x128xf32>
    %17 = tpu.matmul %16, %14, %cst_12 {dimension_numbers = #tpu.dot_dimension_numbers<[1], [0], [0], [1], [0, 0, 1, 1], [], []>} : vector<32x32xf32>, vector<32x128xf32>, vector<32x128xf32> -> vector<32x128xf32>
    %c1 = arith.constant 1 : index
    %c0_13 = arith.constant 0 : index
    %c0_14 = arith.constant 0 : index
    %18 = vector.load %arg4[%c1, %c0_13, %c0_14] : memref<4x32x1xf32, #tpu.memory_space<vmem>>, vector<1x32x1xf32>
    %19 = vector.shape_cast %18 : vector<1x32x1xf32> to vector<32x1xf32>
    %20 = vector.broadcast %19 : vector<32x1xf32> to vector<32x128xf32>
    %21 = arith.addf %17, %20 : vector<32x128xf32>
    %cst_15 = arith.constant 5.000000e-01 : f32
    %22 = vector.broadcast %cst_15 : f32 to vector<32x128xf32>
    %23 = arith.mulf %22, %21 : vector<32x128xf32>
    %24 = math.tanh %23 : vector<32x128xf32>
    %cst_16 = arith.constant 1.000000e+00 : f32
    %25 = vector.broadcast %cst_16 : f32 to vector<32x128xf32>
    %26 = arith.addf %24, %25 : vector<32x128xf32>
    %cst_17 = arith.constant 5.000000e-01 : f32
    %27 = vector.broadcast %cst_17 : f32 to vector<32x128xf32>
    %28 = arith.mulf %27, %26 : vector<32x128xf32>
    %29 = arith.mulf %21, %28 : vector<32x128xf32>
    %c1_18 = arith.constant 1 : index
    %c0_19 = arith.constant 0 : index
    %c0_20 = arith.constant 0 : index
    %30 = vector.load %arg3[%c1_18, %c0_19, %c0_20] : memref<3x32x32xf32, #tpu.memory_space<vmem>>, vector<1x32x32xf32>
    %31 = vector.shape_cast %30 : vector<1x32x32xf32> to vector<32x32xf32>
    %cst_21 = arith.constant dense<0.000000e+00> : vector<32x128xf32>
    %32 = tpu.matmul %31, %29, %cst_21 {dimension_numbers = #tpu.dot_dimension_numbers<[1], [0], [0], [1], [0, 0, 1, 1], [], []>} : vector<32x32xf32>, vector<32x128xf32>, vector<32x128xf32> -> vector<32x128xf32>
    %c2 = arith.constant 2 : index
    %c0_22 = arith.constant 0 : index
    %c0_23 = arith.constant 0 : index
    %33 = vector.load %arg4[%c2, %c0_22, %c0_23] : memref<4x32x1xf32, #tpu.memory_space<vmem>>, vector<1x32x1xf32>
    %34 = vector.shape_cast %33 : vector<1x32x1xf32> to vector<32x1xf32>
    %35 = vector.broadcast %34 : vector<32x1xf32> to vector<32x128xf32>
    %36 = arith.addf %32, %35 : vector<32x128xf32>
    %cst_24 = arith.constant 5.000000e-01 : f32
    %37 = vector.broadcast %cst_24 : f32 to vector<32x128xf32>
    %38 = arith.mulf %37, %36 : vector<32x128xf32>
    %39 = math.tanh %38 : vector<32x128xf32>
    %cst_25 = arith.constant 1.000000e+00 : f32
    %40 = vector.broadcast %cst_25 : f32 to vector<32x128xf32>
    %41 = arith.addf %39, %40 : vector<32x128xf32>
    %cst_26 = arith.constant 5.000000e-01 : f32
    %42 = vector.broadcast %cst_26 : f32 to vector<32x128xf32>
    %43 = arith.mulf %42, %41 : vector<32x128xf32>
    %44 = arith.mulf %36, %43 : vector<32x128xf32>
    %c2_27 = arith.constant 2 : index
    %c0_28 = arith.constant 0 : index
    %c0_29 = arith.constant 0 : index
    %45 = vector.load %arg3[%c2_27, %c0_28, %c0_29] : memref<3x32x32xf32, #tpu.memory_space<vmem>>, vector<1x32x32xf32>
    %46 = vector.shape_cast %45 : vector<1x32x32xf32> to vector<32x32xf32>
    %cst_30 = arith.constant dense<0.000000e+00> : vector<32x128xf32>
    %47 = tpu.matmul %46, %44, %cst_30 {dimension_numbers = #tpu.dot_dimension_numbers<[1], [0], [0], [1], [0, 0, 1, 1], [], []>} : vector<32x32xf32>, vector<32x128xf32>, vector<32x128xf32> -> vector<32x128xf32>
    %c3 = arith.constant 3 : index
    %c0_31 = arith.constant 0 : index
    %c0_32 = arith.constant 0 : index
    %48 = vector.load %arg4[%c3, %c0_31, %c0_32] : memref<4x32x1xf32, #tpu.memory_space<vmem>>, vector<1x32x1xf32>
    %49 = vector.shape_cast %48 : vector<1x32x1xf32> to vector<32x1xf32>
    %50 = vector.extract_strided_slice %47 {offsets = [0, 0], sizes = [1, 128], strides = [1, 1]} : vector<32x128xf32> to vector<1x128xf32>
    %51 = vector.extract_strided_slice %49 {offsets = [0, 0], sizes = [1, 1], strides = [1, 1]} : vector<32x1xf32> to vector<1x1xf32>
    %52 = vector.broadcast %51 : vector<1x1xf32> to vector<1x128xf32>
    %53 = arith.addf %50, %52 : vector<1x128xf32>
    %cst_33 = arith.constant 5.000000e-01 : f32
    %54 = vector.broadcast %cst_33 : f32 to vector<1x128xf32>
    %55 = arith.mulf %54, %53 : vector<1x128xf32>
    %56 = math.tanh %55 : vector<1x128xf32>
    %cst_34 = arith.constant 1.800000e+01 : f32
    %57 = vector.broadcast %cst_34 : f32 to vector<1x128xf32>
    %58 = arith.mulf %57, %56 : vector<1x128xf32>
    %c0_35 = arith.constant 0 : index
    %c0_36 = arith.constant 0 : index
    %59 = vector.load %arg5[%c0_35, %c0_36] : memref<1x128xf32, #tpu.memory_space<vmem>>, vector<1x128xf32>
    tpu.vector_store %arg5[%c0_35, %c0_36], %58 {strides = array<i32>} : memref<1x128xf32, #tpu.memory_space<vmem>>, vector<1x128xf32>,
    return
  }
  func.func @transform_0(%arg0: i32) -> (i32, i32) {
    %c0_i32 = arith.constant 0 : i32
    %c0_i32_0 = arith.constant 0 : i32
    return %c0_i32, %arg0 : i32, i32
  }
  func.func @transform_1(%arg0: i32) -> (i32, i32) {
    %c0_i32 = arith.constant 0 : i32
    %c0_i32_0 = arith.constant 0 : i32
    %c0_i32_1 = arith.constant 0 : i32
    return %c0_i32, %c0_i32_0 : i32, i32
  }
  func.func @transform_2(%arg0: i32) -> (i32, i32, i32) {
    %c0_i32 = arith.constant 0 : i32
    %c0_i32_0 = arith.constant 0 : i32
    %c0_i32_1 = arith.constant 0 : i32
    %c0_i32_2 = arith.constant 0 : i32
    return %c0_i32, %c0_i32_0, %c0_i32_1 : i32, i32, i32
  }
  func.func @transform_3(%arg0: i32) -> (i32, i32, i32) {
    %c0_i32 = arith.constant 0 : i32
    %c0_i32_0 = arith.constant 0 : i32
    %c0_i32_1 = arith.constant 0 : i32
    %c0_i32_2 = arith.constant 0 : i32
    return %c0_i32, %c0_i32_0, %c0_i32_1 : i32, i32, i32
  }
  func.func @transform_4(%arg0: i32) -> (i32, i32) {
    %c0_i32 = arith.constant 0 : i32
    %c0_i32_0 = arith.constant 0 : i32
    return %c0_i32, %arg0 : i32, i32
  }
}

</mosaic_0001>

<bundles_post_ra>
// kernel: tpu_custom_call.1
= control target key start
LH: loop header
LB: loop body
LE: loop exit
PB: predicated region body
PF: predicated region fallthrough
CT: control target
= control target key end

     0   :  { %vm60_vm0 = vcmask 1042432   ;;  %vm47_vm1 = vcmask 23552   ;;  %v761_v5 = vmov 0   ;;  %s897_s0 = inlined_call_operand.vmem [shape: f32[3,128], index: 0, kind: input, shape index: {}]   ;;  %s898_s1 = inlined_call_operand.vmem [shape: f32[32,3], index: 1, kind: input, shape index: {}]   ;;  %s899_s2 = inlined_call_operand.vmem [shape: f32[3,32,32], index: 2, kind: input, shape index: {}]   ;;  %s900_s3 = inlined_call_operand.vmem [shape: f32[4,32,1], index: 3, kind: input, shape index: {}]   ;;  %s901_s4 = inlined_call_operand.hbm [shape: f32[1,128], index: 4, kind: output, shape index: {}]  }
   0x1   :  { %v22_v0 = vld [vmem:[%s897_s0] sm:$0x7]  ;;  %v19_v2 = vld [vmem:[%s898_s1 + $0x8] sm:$0xff]  ;;  %v20_v3 = vld [vmem:[%s898_s1 + $0x10] sm:$0xff]  ;;  %711 = vset.pattern.permute.xlu0 %v761_v5  ;;  %712 = vset.pattern.permute.xlu1 %v761_v5 }
   0x2   :  { %v18_v1 = vld [vmem:[%s898_s1] sm:$0xff]  ;;  %651 = vmatprep.subr.msk.mxu0 %vm60_vm0, %v22_v0  ;;  %v26_v4 = vld [vmem:[%s900_s3 + $0x18] sm:$0xff]  ;;  %v24_v6 = vld [vmem:[%s900_s3 + $0x8] sm:$0xff] }
   0x3   :  { %653 = vmatprep.mubr.msk.f32.mxu0 %vm47_vm1, %v18_v1  ;;  %652 = vmatpush3.msk.msra.mxu0 %vm60_vm0, %v22_v0  ;;  %v21_v7 = vld [vmem:[%s898_s1 + $0x18] sm:$0xff]  ;;  %v25_v8 = vld [vmem:[%s900_s3 + $0x10] sm:$0xff]  ;;  %v23_v9 = vld [vmem:[%s900_s3] sm:$0xff] }
   0x4   :  { %654 = vmatmul.mubr.msk.f32.vlgmr.msra.gmra.mxu0 %vm47_vm1, %v19_v2  ;;  %44 = vperm.xlu0 %711, %v26_v4  }
   0x5   :  { %656 = vmatprep.mubr.msk.f32.mxu0 %vm47_vm1, %v20_v3  ;;  %34 = vperm.xlu1 %712, %v24_v6  }
   0x6   :  { %9 = vsyncpa [#allocation3], 0  ;;  %v596_v10 = vld [vmem:[%s900_s3 + $0x38] sm:$0xff]  ;;  %v595_v11 = vld [vmem:[%s900_s3 + $0x30] sm:$0xff]  ;;  %vm198_vm2 = vcmask 261120   ;;  %s762_s18 = smov [#allocation2]  }
   0x7   :  { %v594_v12 = vld [vmem:[%s900_s3 + $0x28] sm:$0xff]  ;;  %v593_v13 = vld [vmem:[%s900_s3 + $0x20] sm:$0xff]  ;;  %v608_v14 = vld [vmem:[%s900_s3 + $0x58] sm:$0xff]  ;;  %s580_s19 = sshll.u32 %s762_s18, 4  ;;  %s581_s19 = int_to_ptr.vmem [resolvable:$true] %s580_s19 }
   0x8   :  { %657 = vmatmul.mubr.msk.f32.gmra.mxu0 %vm47_vm1, %v21_v7  ;;  %39 = vperm.xlu0 %711, %v25_v8   ;;  %v607_v15 = vld [vmem:[%s900_s3 + $0x50] sm:$0xff]  ;;  %v606_v16 = vld [vmem:[%s900_s3 + $0x48] sm:$0xff]  ;;  %v605_v17 = vld [vmem:[%s900_s3 + $0x40] sm:$0xff]  ;;  %s743_s20 = scalar_lea.vmem %s581_s19, 32  ;;  %p744_p1 = scmp.lt.s32.totalorder %s581_s19, %s581_s19 }
   0x9   :  { %29 = vperm.xlu1 %712, %v23_v9   ;;  %v621_v18 = vld [vmem:[%s900_s3 + $0x60] sm:$0xff]  ;;  %v170_v52 = vld [vmem:[%s899_s2 + $0x8] sm:$0xff]  ;;  %v171_v53 = vld [vmem:[%s899_s2 + $0x10] sm:$0xff] }
   0xa   :  { %v169_v19 = vld [vmem:[%s899_s2] sm:$0xff]  ;;  %v172_v54 = vld [vmem:[%s899_s2 + $0x18] sm:$0xff] }
   0xb   :  { %667 = vmatprep.mubr.msk.f32.mxu1 %vm198_vm2, %v169_v19  ;;  %v601_v55 = vld [vmem:[%s899_s2 + $0x20] sm:$0xff] }
   0xc   :  { %195 = vperm.xlu0 %711, %v596_v10   ;;  %681 = vmatprep.mubr.msk.f32.mxu0 %vm198_vm2, %v601_v55 }
   0xd   :  { %190 = vperm.xlu1 %712, %v595_v11  }
  0x10   :  { %185 = vperm.xlu0 %711, %v594_v12  }
  0x11   :  { %180 = vperm.xlu1 %712, %v593_v13  }
  0x14   :  { %343 = vperm.xlu0 %711, %v608_v14  }
  0x15   :  { %338 = vperm.xlu1 %712, %v607_v15  }
  0x18   :  { %333 = vperm.xlu0 %711, %v606_v16  }
  0x19   :  { %328 = vperm.xlu1 %712, %v605_v17  }
  0x1c   :  { %566 = vperm.xlu0 %711, %v621_v18  }
  0x7f   :  { %v45_v21 = vpop.permute.xlu0 %44 }
  0x80   :  { %v35_v20 = vpop.permute.xlu1 %34 }
  0x83   :  { %v40_v31 = vpop.permute.xlu0 %39 }
  0x84   :  { %v30_v24 = vpop.permute.xlu1 %29 }
  0x87   :  { %v196_v56 = vpop.permute.xlu0 %195 }
  0x88   :  { %v191_v57 = vpop.permute.xlu1 %190 }
  0x8b   :  { %v186_v58 = vpop.permute.xlu0 %185 }
  0x8c   :  { %v181_v61 = vpop.permute.xlu1 %180 }
  0xc4   :  { %v655_v22 = vpop.f32.mrf.mxu0 }
  0xc5   :  { %v136_v23 = vadd.f32 %v655_v22, %v35_v20 }
  0xc6   :  { %v130_v25 = vpop.f32.mrf.mxu0 }
  0xc7   :  { %v150_v26 = vmul.f32 0.5, %v136_v23  ;;  %v131_v27 = vadd.f32 %v130_v25, %v30_v24  ;;  %v602_v24 = vld [vmem:[%s899_s2 + $0x28] sm:$0xff]  ;;  %v603_v25 = vld [vmem:[%s899_s2 + $0x30] sm:$0xff] }
  0xc8   :  { %v658_v28 = vpop.f32.mrf.mxu0 }
  0xc9   :  { %v149_v29 = vmul.f32 0.5, %v131_v27  ;;  %v146_v30 = vadd.f32 %v658_v28, %v45_v21  ;;  %713 = vtanh.f32 %v150_v26  ;;  %v604_v26 = vld [vmem:[%s899_s2 + $0x38] sm:$0xff]  ;;  %v615_v28 = vld [vmem:[%s899_s2 + $0x50] sm:$0xff] }
  0xca   :  { %v140_v32 = vpop.f32.mrf.mxu0 }
  0xcb   :  { %v152_v33 = vmul.f32 0.5, %v146_v30  ;;  %v141_v34 = vadd.f32 %v140_v32, %v40_v31  ;;  %715 = vtanh.f32 %v149_v29  ;;  %v344_v29 = vpop.permute.xlu0 %343 }
  0xcd   :  { %717 = vtanh.f32 %v152_v33  ;;  %v151_v35 = vmul.f32 0.5, %v141_v34 }
  0xcf   :  { %719 = vtanh.f32 %v151_v35  ;;  %v334_v31 = vpop.permute.xlu0 %333 }
  0xd6   :  { %v714_v36 = vpop.eup %713 }
  0xd7   :  { %v158_v39 = vadd.f32 1.0, %v714_v36 }
  0xd8   :  { %v716_v37 = vpop.eup %715 }
  0xd9   :  { %v157_v42 = vadd.f32 1.0, %v716_v37  ;;  %v162_v45 = vmul.f32 0.5, %v158_v39 }
  0xda   :  { %v718_v38 = vpop.eup %717 }
  0xdb   :  { %v160_v40 = vadd.f32 1.0, %v718_v38  ;;  %v161_v48 = vmul.f32 0.5, %v157_v42  ;;  %v166_v50 = vmul.f32 %v162_v45, %v136_v23 }
  0xdc   :  { %v720_v41 = vpop.eup %719 }
  0xdd   :  { %v159_v43 = vadd.f32 1.0, %v720_v41  ;;  %v164_v44 = vmul.f32 0.5, %v160_v40  ;;  %v165_v51 = vmul.f32 %v161_v48, %v131_v27  ;;  %v613_v27 = vld [vmem:[%s899_s2 + $0x40] sm:$0xff] }
  0xdf   :  { %v163_v46 = vmul.f32 0.5, %v159_v43  ;;  %v168_v47 = vmul.f32 %v164_v44, %v146_v30  ;;  %v339_v30 = vpop.permute.xlu1 %338 }
  0xe1   :  { %v167_v49 = vmul.f32 %v163_v46, %v141_v34  ;;  %659 = vmatprep.subr.mxu1 %v168_v47 }
  0xe2   :  { %660 = vmatpush3.msra.mxu1 %v168_v47 }
  0xe3   :  { %661 = vmatprep.subr.mxu1 %v167_v49  ;;  %v329_v34 = vpop.permute.xlu1 %328 }
  0xe4   :  { %662 = vmatpush3.msra.mxu1 %v167_v49 }
  0xe5   :  { %663 = vmatprep.subr.mxu1 %v166_v50 }
  0xe6   :  { %664 = vmatpush3.msra.mxu1 %v166_v50 }
  0xe7   :  { %665 = vmatprep.subr.mxu1 %v165_v51 }
  0xe8   :  { %666 = vmatpush3.msra.mxu1 %v165_v51 }
  0xe9   :  { %668 = vmatmul.mubr.msk.f32.vlgmr.msra.gmra.mxu1 %vm198_vm2, %v170_v52 }
  0xea   :  { %670 = vmatprep.mubr.msk.f32.mxu1 %vm198_vm2, %v171_v53 }
  0xed   :  { %671 = vmatmul.mubr.msk.f32.gmra.mxu1 %vm198_vm2, %v172_v54 }
  0xee   :  { %698 = vmatprep.mubr.msk.f32.mxu1 %vm198_vm2, %v615_v28 }
 0x1a9   :  { %v669_v59 = vpop.f32.mrf.mxu1 }
 0x1aa   :  { %v283_v60 = vadd.f32 %v669_v59, %v186_v58 }
 0x1ab   :  { %v277_v62 = vpop.f32.mrf.mxu1 }
 0x1ac   :  { %v297_v63 = vmul.f32 0.5, %v283_v60  ;;  %v278_v0 = vadd.f32 %v277_v62, %v181_v61  ;;  %v614_v61 = vld [vmem:[%s899_s2 + $0x48] sm:$0xff]  ;;  %v616_v62 = vld [vmem:[%s899_s2 + $0x58] sm:$0xff]  ;;  %s739_s2 = scalar_lea.vmem %s581_s19, 16 }
 0x1ad   :  { %v672_v1 = vpop.f32.mrf.mxu1  ;;  %p740_p0 = scmp.ne.s32.totalorder %s581_s19, %s739_s2  ;;  %p745_p2 = scmp.lt.s32.totalorder %s743_s20, %s739_s2 }
 0x1ae   :  { %v296_v2 = vmul.f32 0.5, %v278_v0  ;;  %v293_v3 = vadd.f32 %v672_v1, %v196_v56  ;;  %721 = vtanh.f32 %v297_v63  ;;  %v567_v1 = vpop.permute.xlu0 %566 }
 0x1af   :  { %v287_v4 = vpop.f32.mrf.mxu1  ;;  %p746_p3 = por %p745_p2, %p744_p1 }
 0x1b0   :  { %v299_v5 = vmul.f32 0.5, %v293_v3  ;;  %v288_v6 = vadd.f32 %v287_v4, %v191_v57  ;;  %723 = vtanh.f32 %v296_v2 }
 0x1b1   :  { %p747_p4 = pnand %p746_p3, %p740_p0 }
 0x1b2   :  { %725 = vtanh.f32 %v299_v5  ;;  %v298_v7 = vmul.f32 0.5, %v288_v6 }
 0x1b4   :  { %727 = vtanh.f32 %v298_v7 }
 0x1bb   :  { %v722_v8 = vpop.eup %721 }
 0x1bc   :  { %v305_v11 = vadd.f32 1.0, %v722_v8 }
 0x1bd   :  { %v724_v9 = vpop.eup %723 }
 0x1be   :  { %v304_v14 = vadd.f32 1.0, %v724_v9  ;;  %v309_v17 = vmul.f32 0.5, %v305_v11 }
 0x1bf   :  { %v726_v10 = vpop.eup %725 }
 0x1c0   :  { %v307_v12 = vadd.f32 1.0, %v726_v10  ;;  %v308_v20 = vmul.f32 0.5, %v304_v14  ;;  %v313_v22 = vmul.f32 %v309_v17, %v283_v60 }
 0x1c1   :  { %v728_v13 = vpop.eup %727 }
 0x1c2   :  { %v311_v15 = vmul.f32 0.5, %v307_v12  ;;  %v306_v16 = vadd.f32 1.0, %v728_v13  ;;  %v312_v23 = vmul.f32 %v308_v20, %v278_v0 }
 0x1c4   :  { %v315_v18 = vmul.f32 %v311_v15, %v293_v3  ;;  %v310_v19 = vmul.f32 0.5, %v306_v16 }
 0x1c6   :  { %v314_v21 = vmul.f32 %v310_v19, %v288_v6  ;;  %673 = vmatprep.subr.mxu0 %v315_v18 }
 0x1c7   :  { %674 = vmatpush3.msra.mxu0 %v315_v18 }
 0x1c8   :  { %675 = vmatprep.subr.mxu0 %v314_v21 }
 0x1c9   :  { %676 = vmatpush3.msra.mxu0 %v314_v21 }
 0x1ca   :  { %677 = vmatprep.subr.mxu0 %v313_v22 }
 0x1cb   :  { %678 = vmatpush3.msra.mxu0 %v313_v22 }
 0x1cc   :  { %679 = vmatprep.subr.mxu0 %v312_v23 }
 0x1cd   :  { %680 = vmatpush3.msra.mxu0 %v312_v23 }
 0x1ce   :  { %682 = vmatmul.mubr.msk.f32.vlgmr.msra.gmra.mxu0 %vm198_vm2, %v602_v24 }
 0x1cf   :  { %684 = vmatprep.mubr.msk.f32.mxu0 %vm198_vm2, %v603_v25 }
 0x1d2   :  { %685 = vmatmul.mubr.msk.f32.gmra.mxu0 %vm198_vm2, %v604_v26 }
 0x1d3   :  { %695 = vmatprep.mubr.msk.f32.mxu0 %vm198_vm2, %v613_v27 }
 0x28e   :  { %v683_v32 = vpop.f32.mrf.mxu0 }
 0x28f   :  { %v430_v33 = vadd.f32 %v683_v32, %v334_v31 }
 0x290   :  { %v424_v35 = vpop.f32.mrf.mxu0 }
 0x291   :  { %v444_v36 = vmul.f32 0.5, %v430_v33  ;;  %v425_v37 = vadd.f32 %v424_v35, %v329_v34 }
 0x292   :  { %v686_v38 = vpop.f32.mrf.mxu0 }
 0x293   :  { %v443_v39 = vmul.f32 0.5, %v425_v37  ;;  %v440_v40 = vadd.f32 %v686_v38, %v344_v29  ;;  %729 = vtanh.f32 %v444_v36 }
 0x294   :  { %v434_v41 = vpop.f32.mrf.mxu0 }
 0x295   :  { %v446_v42 = vmul.f32 0.5, %v440_v40  ;;  %v435_v43 = vadd.f32 %v434_v41, %v339_v30  ;;  %731 = vtanh.f32 %v443_v39 }
 0x297   :  { %733 = vtanh.f32 %v446_v42  ;;  %v445_v44 = vmul.f32 0.5, %v435_v43 }
 0x299   :  { %735 = vtanh.f32 %v445_v44 }
 0x2a0   :  { %v730_v45 = vpop.eup %729 }
 0x2a1   :  { %v452_v48 = vadd.f32 1.0, %v730_v45 }
 0x2a2   :  { %v732_v46 = vpop.eup %731 }
 0x2a3   :  { %v451_v51 = vadd.f32 1.0, %v732_v46  ;;  %v456_v54 = vmul.f32 0.5, %v452_v48 }
 0x2a4   :  { %v734_v47 = vpop.eup %733 }
 0x2a5   :  { %v454_v49 = vadd.f32 1.0, %v734_v47  ;;  %v455_v57 = vmul.f32 0.5, %v451_v51  ;;  %v460_v59 = vmul.f32 %v456_v54, %v430_v33 }
 0x2a6   :  { %v736_v50 = vpop.eup %735 }
 0x2a7   :  { %v458_v52 = vmul.f32 0.5, %v454_v49  ;;  %v453_v53 = vadd.f32 1.0, %v736_v50  ;;  %v459_v60 = vmul.f32 %v455_v57, %v425_v37 }
 0x2a9   :  { %v462_v55 = vmul.f32 %v458_v52, %v440_v40  ;;  %v457_v56 = vmul.f32 0.5, %v453_v53 }
 0x2ab   :  { %v461_v58 = vmul.f32 %v457_v56, %v435_v43  ;;  %687 = vmatprep.subr.mxu0 %v462_v55  ;;  %701 = vmatprep.subr.mxu1 %v462_v55 }
 0x2ac   :  { %688 = vmatpush3.msra.mxu0 %v462_v55  ;;  %705 = vmatpush3.msra.mxu1 %v462_v55 }
 0x2ad   :  { %689 = vmatprep.subr.mxu0 %v461_v58  ;;  %702 = vmatprep.subr.mxu1 %v461_v58 }
 0x2ae   :  { %690 = vmatpush3.msra.mxu0 %v461_v58  ;;  %706 = vmatpush3.msra.mxu1 %v461_v58 }
 0x2af   :  { %691 = vmatprep.subr.mxu0 %v460_v59  ;;  %703 = vmatprep.subr.mxu1 %v460_v59 }
 0x2b0   :  { %692 = vmatpush3.msra.mxu0 %v460_v59  ;;  %707 = vmatpush3.msra.mxu1 %v460_v59 }
 0x2b1   :  { %693 = vmatprep.subr.mxu0 %v459_v60  ;;  %704 = vmatprep.subr.mxu1 %v459_v60 }
 0x2b2   :  { %694 = vmatpush3.msra.mxu0 %v459_v60  ;;  %708 = vmatpush3.msra.mxu1 %v459_v60 }
 0x2b3   :  { %696 = vmatmul.mubr.msk.f32.vlgmr.msra.gmra.mxu0 %vm198_vm2, %v614_v61  ;;  %699 = vmatmul.mubr.msk.f32.vlgmr.msra.gmra.mxu1 %vm198_vm2, %v616_v62 }
 0x373   :  { %v697_v63 = vpop.f32.mrf.mxu0  ;;  %v700_v0 = vpop.f32.mrf.mxu1 }
 0x375   :  { %v546_v2 = vpop.f32.mrf.mxu0  ;;  %v555_v3 = vpop.f32.mrf.mxu1 }
 0x376   :  { %v569_v4 = vadd.f32 %v567_v1, %v546_v2 }
 0x378   :  { %v570_v5 = vmul.f32 0.5, %v569_v4 }
 0x37a   :  { %737 = vtanh.f32 %v570_v5 }
 0x387   :  { %v738_v6 = vpop.eup %737 }
 0x388   :  { %v572_v7 = vmul.f32 18.0, %v738_v6 }
 0x38a   :  { %573 = vst [vmem:[#allocation2] sm:$0x1] %v572_v7 }
 0x38b   :  { %750 = shalt.err (!%p747_p4)
}
 0x38c   :  { %583 = dma.vmem_to_hbm [thread:$0]  %s581_s19, 16, %s901_s4, [#allocation3]  }
 0x38d   :  { %759 = dma.done.wait [#allocation3], 16  }
 0x38e   :  { %760 = vsyncadd [#allocation3], 4294967280 }
 0x38f   :  { %587 = vsyncpa [#allocation3], 1 }

</bundles_post_ra>
